<compile_context>
chip_gen: v6e
topology: v6e:2x2x1
jax: 0.10.0
libtpu: 0.0.40
codegen_flags: <defaults>
</compile_context>

<pallas_src>
import functools

import numpy as np
import jax
import jax.numpy as jnp
from jax.experimental import pallas as pl
from jax.experimental.pallas import tpu as pltpu


def _dwconv3x3_kernel(x_ref, w_ref, m_ref, o_ref, *, W):
    # x_ref: (R, H*W)  flattened images, one (n, c) channel-image per row
    # w_ref: (R, 9)    per-row (= per-channel) 3x3 weights, taps in kh*3+kw order
    # m_ref: (9, H*W)  0/1 boundary masks per tap (implements padding=1 halo)
    # o_ref: (R, H*W)  output rows (lane-dense store)
    HW = x_ref.shape[1]
    x = x_ref[...].astype(jnp.float32)        # hoisted loads (read once per block)
    wts = w_ref[...].astype(jnp.float32)
    masks = m_ref[...]
    acc = jnp.zeros(x.shape, jnp.float32)

    # 9 statically-unrolled taps: lane rotate (XLU) + mask + per-row weight MAC (VPU).
    for kh in range(3):
        for kw in range(3):
            k = kh * 3 + kw
            off = (kh - 1) * W + (kw - 1)          # flat offset of this tap
            if off == 0:
                shifted = x
            else:
                # shifted[p] = x[p + off]; positions that wrapped are masked to 0.
                shifted = pltpu.roll(x, shift=(-off) % HW, axis=1)
            acc = acc + (shifted * masks[k:k + 1, :]) * wts[:, k:k + 1]

    o_ref[...] = acc.astype(o_ref.dtype)


def depthwise_conv3x3_pallas(x_nchw, weight_oihw, *, rows_per_step=8):
    """x_nchw: (N, C, H, W); weight_oihw: (C, 1, 3, 3) -- PyTorch conventions.

    Returns (N, C, H, W), matching
    nn.Conv2d(C, C, 3, stride=1, padding=1, groups=C, bias=False).
    """
    # TODO(synk): stride > 1 not implemented (module default stride=1).
    N, C, H, W = x_nchw.shape
    NC, HW = N * C, H * W

    # Free row-major reshapes only -- no pad / transpose HBM round trips.
    x_flat = x_nchw.reshape(NC, HW)                          # (NC, HW)
    w_rows = jnp.tile(weight_oihw.reshape(C, 9), (N, 1))     # (NC, 9), tiny

    # Precompute 0/1 boundary masks for the 9 taps (the padding=1 halo), as a
    # trace-time constant -- avoids any in-kernel integer div/mod.
    hh = np.arange(HW) // W
    ww = np.arange(HW) % W
    m = np.zeros((9, HW), np.float32)
    for kh in range(3):
        for kw in range(3):
            dh, dw = kh - 1, kw - 1
            m[kh * 3 + kw] = ((hh + dh >= 0) & (hh + dh < H) &
                              (ww + dw >= 0) & (ww + dw < W))
    masks = jnp.asarray(m)

    if NC < rows_per_step:
        rows_per_step = NC            # block == full dim is always legal
    grid = (pl.cdiv(NC, rows_per_step),)

    out_flat = pl.pallas_call(
        functools.partial(_dwconv3x3_kernel, W=W),
        out_shape=jax.ShapeDtypeStruct((NC, HW), x_nchw.dtype),
        grid_spec=pltpu.PrefetchScalarGridSpec(
            num_scalar_prefetch=0,
            grid=grid,
            in_specs=[
                pl.BlockSpec((rows_per_step, HW), lambda r: (r, 0)),
                pl.BlockSpec((rows_per_step, 9), lambda r: (r, 0)),
                pl.BlockSpec((9, HW), lambda r: (0, 0)),
            ],
            out_specs=pl.BlockSpec((rows_per_step, HW), lambda r: (r, 0)),
        ),
        compiler_params=pltpu.CompilerParams(
            dimension_semantics=("parallel",),
        ),
    )(x_flat, w_rows, masks)

    return out_flat.reshape(N, C, H, W)


if __name__ == "__main__":
    key = jax.random.PRNGKey(0)
    kx, kw = jax.random.split(key)

    # Module default: inp=10 channels, stride=1. Small spatial size.
    N, C, H, W = 2, 10, 16, 16
    x = jax.random.normal(kx, (N, C, H, W), dtype=jnp.float32)
    # nn.Conv2d weight shape for groups=C depthwise: (C, 1, 3, 3)
    weight = jax.random.normal(kw, (C, 1, 3, 3), dtype=jnp.float32) * 0.1

    out = jax.jit(depthwise_conv3x3_pallas)(x, weight)
    out = jax.block_until_ready(out)

    # Reference check with XLA's grouped convolution (same semantics as PyTorch).
    ref = jax.lax.conv_general_dilated(
        x, weight,
        window_strides=(1, 1),
        padding=((1, 1), (1, 1)),
        dimension_numbers=("NCHW", "OIHW", "NCHW"),
        feature_group_count=C,
    )
    assert out.shape == (N, C, H, W)
    assert jnp.allclose(out, ref, atol=1e-5, rtol=1e-5)

    print("KERNEL_OK")
</pallas_src>

<mosaic_0001>
module attributes {stable_mosaic.version = 11 : i64} {
  func.func @_dwconv3x3_kernel(%arg0: i32, %arg1: memref<8x256xf32, #tpu.memory_space<vmem>>, %arg2: memref<8x9xf32, #tpu.memory_space<vmem>>, %arg3: memref<9x256xf32, #tpu.memory_space<vmem>>, %arg4: memref<8x256xf32, #tpu.memory_space<vmem>>) attributes {dimension_semantics = [#tpu.dimension_semantics<parallel>], iteration_bounds = array<i64: 3>, scalar_prefetch = 0 : i64, scratch_operands = 0 : i64, tpu.core_type = #tpu.core_type<tc>, window_params = [{transform_indices = @transform_0, window_bounds = array<i64: 8, 256>}, {transform_indices = @transform_1, window_bounds = array<i64: 8, 9>}, {pipeline_mode = #tpu.pipeline_mode<synchronous>, transform_indices = @transform_2, window_bounds = array<i64: 9, 256>}, {transform_indices = @transform_3, window_bounds = array<i64: 8, 256>}]} {
    %c0 = arith.constant 0 : index
    %c0_0 = arith.constant 0 : index
    %0 = vector.load %arg1[%c0, %c0_0] : memref<8x256xf32, #tpu.memory_space<vmem>>, vector<8x256xf32>
    %c0_1 = arith.constant 0 : index
    %c0_2 = arith.constant 0 : index
    %1 = vector.load %arg2[%c0_1, %c0_2] : memref<8x9xf32, #tpu.memory_space<vmem>>, vector<8x9xf32>
    %c0_3 = arith.constant 0 : index
    %c0_4 = arith.constant 0 : index
    %2 = vector.load %arg3[%c0_3, %c0_4] : memref<9x256xf32, #tpu.memory_space<vmem>>, vector<9x256xf32>
    %cst = arith.constant 0.000000e+00 : f32
    %3 = vector.broadcast %cst : f32 to vector<8x256xf32>
    %c17_i32 = arith.constant 17 : i32
    %4 = tpu.dynamic_rotate %0 by %c17_i32 dim 1 : vector<8x256xf32>, i32 -> vector<8x256xf32>
    %5 = vector.extract_strided_slice %2 {offsets = [0, 0], sizes = [1, 256], strides = [1, 1]} : vector<9x256xf32> to vector<1x256xf32>
    %6 = vector.broadcast %5 : vector<1x256xf32> to vector<8x256xf32>
    %7 = arith.mulf %4, %6 : vector<8x256xf32>
    %8 = vector.extract_strided_slice %1 {offsets = [0, 0], sizes = [8, 1], strides = [1, 1]} : vector<8x9xf32> to vector<8x1xf32>
    %9 = vector.broadcast %8 : vector<8x1xf32> to vector<8x256xf32>
    %10 = arith.mulf %7, %9 : vector<8x256xf32>
    %11 = arith.addf %3, %10 : vector<8x256xf32>
    %c16_i32 = arith.constant 16 : i32
    %12 = tpu.dynamic_rotate %0 by %c16_i32 dim 1 : vector<8x256xf32>, i32 -> vector<8x256xf32>
    %13 = vector.extract_strided_slice %2 {offsets = [1, 0], sizes = [1, 256], strides = [1, 1]} : vector<9x256xf32> to vector<1x256xf32>
    %14 = vector.broadcast %13 : vector<1x256xf32> to vector<8x256xf32>
    %15 = arith.mulf %12, %14 : vector<8x256xf32>
    %16 = vector.extract_strided_slice %1 {offsets = [0, 1], sizes = [8, 1], strides = [1, 1]} : vector<8x9xf32> to vector<8x1xf32>
    %17 = vector.broadcast %16 : vector<8x1xf32> to vector<8x256xf32>
    %18 = arith.mulf %15, %17 : vector<8x256xf32>
    %19 = arith.addf %11, %18 : vector<8x256xf32>
    %c15_i32 = arith.constant 15 : i32
    %20 = tpu.dynamic_rotate %0 by %c15_i32 dim 1 : vector<8x256xf32>, i32 -> vector<8x256xf32>
    %21 = vector.extract_strided_slice %2 {offsets = [2, 0], sizes = [1, 256], strides = [1, 1]} : vector<9x256xf32> to vector<1x256xf32>
    %22 = vector.broadcast %21 : vector<1x256xf32> to vector<8x256xf32>
    %23 = arith.mulf %20, %22 : vector<8x256xf32>
    %24 = vector.extract_strided_slice %1 {offsets = [0, 2], sizes = [8, 1], strides = [1, 1]} : vector<8x9xf32> to vector<8x1xf32>
    %25 = vector.broadcast %24 : vector<8x1xf32> to vector<8x256xf32>
    %26 = arith.mulf %23, %25 : vector<8x256xf32>
    %27 = arith.addf %19, %26 : vector<8x256xf32>
    %c1_i32 = arith.constant 1 : i32
    %28 = tpu.dynamic_rotate %0 by %c1_i32 dim 1 : vector<8x256xf32>, i32 -> vector<8x256xf32>
    %29 = vector.extract_strided_slice %2 {offsets = [3, 0], sizes = [1, 256], strides = [1, 1]} : vector<9x256xf32> to vector<1x256xf32>
    %30 = vector.broadcast %29 : vector<1x256xf32> to vector<8x256xf32>
    %31 = arith.mulf %28, %30 : vector<8x256xf32>
    %32 = vector.extract_strided_slice %1 {offsets = [0, 3], sizes = [8, 1], strides = [1, 1]} : vector<8x9xf32> to vector<8x1xf32>
    %33 = vector.broadcast %32 : vector<8x1xf32> to vector<8x256xf32>
    %34 = arith.mulf %31, %33 : vector<8x256xf32>
    %35 = arith.addf %27, %34 : vector<8x256xf32>
    %36 = vector.extract_strided_slice %2 {offsets = [4, 0], sizes = [1, 256], strides = [1, 1]} : vector<9x256xf32> to vector<1x256xf32>
    %37 = vector.broadcast %36 : vector<1x256xf32> to vector<8x256xf32>
    %38 = arith.mulf %0, %37 : vector<8x256xf32>
    %39 = vector.extract_strided_slice %1 {offsets = [0, 4], sizes = [8, 1], strides = [1, 1]} : vector<8x9xf32> to vector<8x1xf32>
    %40 = vector.broadcast %39 : vector<8x1xf32> to vector<8x256xf32>
    %41 = arith.mulf %38, %40 : vector<8x256xf32>
    %42 = arith.addf %35, %41 : vector<8x256xf32>
    %c255_i32 = arith.constant 255 : i32
    %43 = tpu.dynamic_rotate %0 by %c255_i32 dim 1 : vector<8x256xf32>, i32 -> vector<8x256xf32>
    %44 = vector.extract_strided_slice %2 {offsets = [5, 0], sizes = [1, 256], strides = [1, 1]} : vector<9x256xf32> to vector<1x256xf32>
    %45 = vector.broadcast %44 : vector<1x256xf32> to vector<8x256xf32>
    %46 = arith.mulf %43, %45 : vector<8x256xf32>
    %47 = vector.extract_strided_slice %1 {offsets = [0, 5], sizes = [8, 1], strides = [1, 1]} : vector<8x9xf32> to vector<8x1xf32>
    %48 = vector.broadcast %47 : vector<8x1xf32> to vector<8x256xf32>
    %49 = arith.mulf %46, %48 : vector<8x256xf32>
    %50 = arith.addf %42, %49 : vector<8x256xf32>
    %c241_i32 = arith.constant 241 : i32
    %51 = tpu.dynamic_rotate %0 by %c241_i32 dim 1 : vector<8x256xf32>, i32 -> vector<8x256xf32>
    %52 = vector.extract_strided_slice %2 {offsets = [6, 0], sizes = [1, 256], strides = [1, 1]} : vector<9x256xf32> to vector<1x256xf32>
    %53 = vector.broadcast %52 : vector<1x256xf32> to vector<8x256xf32>
    %54 = arith.mulf %51, %53 : vector<8x256xf32>
    %55 = vector.extract_strided_slice %1 {offsets = [0, 6], sizes = [8, 1], strides = [1, 1]} : vector<8x9xf32> to vector<8x1xf32>
    %56 = vector.broadcast %55 : vector<8x1xf32> to vector<8x256xf32>
    %57 = arith.mulf %54, %56 : vector<8x256xf32>
    %58 = arith.addf %50, %57 : vector<8x256xf32>
    %c240_i32 = arith.constant 240 : i32
    %59 = tpu.dynamic_rotate %0 by %c240_i32 dim 1 : vector<8x256xf32>, i32 -> vector<8x256xf32>
    %60 = vector.extract_strided_slice %2 {offsets = [7, 0], sizes = [1, 256], strides = [1, 1]} : vector<9x256xf32> to vector<1x256xf32>
    %61 = vector.broadcast %60 : vector<1x256xf32> to vector<8x256xf32>
    %62 = arith.mulf %59, %61 : vector<8x256xf32>
    %63 = vector.extract_strided_slice %1 {offsets = [0, 7], sizes = [8, 1], strides = [1, 1]} : vector<8x9xf32> to vector<8x1xf32>
    %64 = vector.broadcast %63 : vector<8x1xf32> to vector<8x256xf32>
    %65 = arith.mulf %62, %64 : vector<8x256xf32>
    %66 = arith.addf %58, %65 : vector<8x256xf32>
    %c239_i32 = arith.constant 239 : i32
    %67 = tpu.dynamic_rotate %0 by %c239_i32 dim 1 : vector<8x256xf32>, i32 -> vector<8x256xf32>
    %68 = vector.extract_strided_slice %2 {offsets = [8, 0], sizes = [1, 256], strides = [1, 1]} : vector<9x256xf32> to vector<1x256xf32>
    %69 = vector.broadcast %68 : vector<1x256xf32> to vector<8x256xf32>
    %70 = arith.mulf %67, %69 : vector<8x256xf32>
    %71 = vector.extract_strided_slice %1 {offsets = [0, 8], sizes = [8, 1], strides = [1, 1]} : vector<8x9xf32> to vector<8x1xf32>
    %72 = vector.broadcast %71 : vector<8x1xf32> to vector<8x256xf32>
    %73 = arith.mulf %70, %72 : vector<8x256xf32>
    %74 = arith.addf %66, %73 : vector<8x256xf32>
    %c0_5 = arith.constant 0 : index
    %c0_6 = arith.constant 0 : index
    %75 = vector.load %arg4[%c0_5, %c0_6] : memref<8x256xf32, #tpu.memory_space<vmem>>, vector<8x256xf32>
    tpu.vector_store %arg4[%c0_5, %c0_6], %74 {strides = array<i32>} : memref<8x256xf32, #tpu.memory_space<vmem>>, vector<8x256xf32>,
    return
  }
  func.func @transform_0(%arg0: i32) -> (i32, i32) {
    %c0_i32 = arith.constant 0 : i32
    %c0_i32_0 = arith.constant 0 : i32
    return %arg0, %c0_i32 : i32, i32
  }
  func.func @transform_1(%arg0: i32) -> (i32, i32) {
    %c0_i32 = arith.constant 0 : i32
    %c0_i32_0 = arith.constant 0 : i32
    return %arg0, %c0_i32 : i32, i32
  }
  func.func @transform_2(%arg0: i32) -> (i32, i32) {
    %c0_i32 = arith.constant 0 : i32
    %c0_i32_0 = arith.constant 0 : i32
    %c0_i32_1 = arith.constant 0 : i32
    return %c0_i32, %c0_i32_0 : i32, i32
  }
  func.func @transform_3(%arg0: i32) -> (i32, i32) {
    %c0_i32 = arith.constant 0 : i32
    %c0_i32_0 = arith.constant 0 : i32
    return %arg0, %c0_i32 : i32, i32
  }
}

</mosaic_0001>

<bundles_post_ra>
// kernel: tile.7
= control target key start
LH: loop header
LB: loop body
LE: loop exit
PB: predicated region body
PF: predicated region fallthrough
CT: control target
= control target key end

     0   :  { %vm48_vm0 = vcmask 1047556   ;;  %vm50_vm1 = vcmask 80896   ;;  %vm65_vm2 = vcmask 162896   ;;  %s142_s0 = inlined_call_operand.vmem [shape: f32[2,10,9], index: 0, kind: input, shape index: {}]   ;;  %s143_s1 = inlined_call_operand.vmem [shape: f32[20,9], index: 1, kind: output, shape index: {}]  }
   0x1   :  { %v82_v0 = vld [vmem:[%s142_s0 + $0xe] sm:$0x3]  ;;  %v83_v1 = vld [vmem:[%s142_s0 + $0xc] sm:$0x3]  ;;  %v84_v2 = vld [vmem:[%s142_s0 + $0xa] sm:$0x3] }
   0x2   :  { %14 = vst [vmem:[#allocation0 + $0x38] sm:$0x3] %v82_v0  ;;  %19 = vst [vmem:[#allocation0 + $0x30] sm:$0x3] %v83_v1  ;;  %v85_v3 = vld [vmem:[%s142_s0 + $0x8] sm:$0x3] }
   0x3   :  { %24 = vst [vmem:[#allocation0 + $0x28] sm:$0x3] %v84_v2  ;;  %v86_v4 = vld [vmem:[%s142_s0 + $0x6] sm:$0x3]  ;;  %v87_v5 = vld [vmem:[%s142_s0 + $0x4] sm:$0x3] }
   0x4   :  { %29 = vst [vmem:[#allocation0 + $0x20] sm:$0x3] %v85_v3  ;;  %34 = vst [vmem:[#allocation0 + $0x18] sm:$0x3] %v86_v4  ;;  %v88_v6 = vld [vmem:[%s142_s0 + $0x2] sm:$0x3] }
   0x5   :  { %39 = vst [vmem:[#allocation0 + $0x10] sm:$0x3] %v87_v5  ;;  %v44_v7 = vld [vmem:[%s142_s0] sm:$0x3]  ;;  %43 = vst [vmem:[#allocation0 + $0x8] sm:$0x3] %v88_v6 }
   0x6   :  { %45 = vst [vmem:[#allocation0] sm:$0x3] %v44_v7  ;;  %v81_v8 = vld [vmem:[%s142_s0 + $0x10] sm:$0x3]  ;;  %s92_s0 = smov 10  }
   0x7   :  { %9 = vst [vmem:[#allocation0 + $0x40] sm:$0x3] %v81_v8 }
   0xb   :  { %v60_v9 = vld [vmem:[#allocation0 + $0x1] ss:$8 sm:$0xf0]   ;;  %v47_v10 = vld [vmem:[#allocation0] ss:$8 sm:$0xf0]  }
   0xd   :  { %v46_v11 = vld [vmem:[#allocation0] ss:$8 sm:$0xf]   ;;  %v58_v12 = vld [vmem:[#allocation0 + $0x1] ss:$8 sm:$0xf]  }
   0xe   :  { %v62_v13 = vsel %vm48_vm0, %v60_v9, %v58_v12  ;;  %v49_v14 = vsel %vm48_vm0, %v47_v10, %v46_v11  ;;  %v53_v15 = vld [vmem:[#allocation0 + $0x40] sm:$0x1]   ;;  %v68_v16 = vld [vmem:[#allocation0 + $0x41] sm:$0x1]  }
   0xf   :  { %63 = vrot.lane.b32.xlu0 %v62_v13, %s92_s0  ;;  %51 = vst.msk [vmem:[%s143_s1] sm:$0xff] %vm50_vm1, %v49_v14   ;;  %89 = vst.msk [vmem:[%s143_s1 + $0x8] sm:$0x1] %vm50_vm1, %v53_v15  }
  0x13   :  { %69 = vrot.lane.b32.xlu0 %v68_v16, %s92_s0 }
  0x81   :  { %v64_v17 = vpop.permute.xlu0 %63  }
  0x82   :  { %66 = vst.msk [vmem:[%s143_s1] sm:$0xff] %vm65_vm2, %v64_v17  }
  0x85   :  { %v70_v18 = vpop.permute.xlu0 %69  }
  0x86   :  { %90 = vst.msk [vmem:[%s143_s1 + $0x8] sm:$0x1] %vm65_vm2, %v70_v18  }

// kernel: depthwise_conv3x3_pallas.1
= control target key start
LH: loop header
LB: loop body
LE: loop exit
PB: predicated region body
PF: predicated region fallthrough
CT: control target
= control target key end

     0   :  { %s580_s12 = smov 0   ;;  %s722_s0 = inlined_call_operand.vmem [shape: f32[20,256], index: 0, kind: input, shape index: {}]   ;;  %s723_s1 = inlined_call_operand.vmem [shape: f32[20,9], index: 1, kind: input, shape index: {}]   ;;  %s724_s2 = inlined_call_operand.vmem [shape: f32[9,256], index: 2, kind: input, shape index: {}]   ;;  %s725_s3 = inlined_call_operand.vmem [shape: f32[20,256], index: 3, kind: output, shape index: {}]  }
   0x1 LB: > { %s485_s13 = sadd.s32 4294967295, %s541_s12   ;;  %p489_p0 = scmp.ge.s32.totalorder %s541_s12, 1  ;;  %s541_s12 = sphi %s580_s12, %s13_s12  }
   0x2   : > { %p146_p1 = scmp.lt.s32.totalorder %s541_s12, 4 }
   0x4   : > { %p147_p2 = pnand %p489_p0, %p146_p1 }
   0x5   : > { %p174_p3 = scmp.lt.s32.totalorder (!%p147_p2), %s485_s13, 2  ;;  %s545_s22 = smov (!%p147_p2), 17  }
   0x6   : > { %150 = sbr.rel (%p147_p2) target bundleno = 204 (0xcc), region = 32  ;;  %s547_s23 = smov (!%p147_p2), 16  }
   0x7   : > { %s549_s24 = smov (!%p147_p2), 15   ;;  %s551_s25 = smov (!%p147_p2), 1  }
   0x8   : > { %s553_s26 = smov (!%p147_p2), 127   ;;  %s555_s27 = smov (!%p147_p2), 113  }
   0x9   : > { %s558_s28 = smov (!%p147_p2), 112   ;;  %s559_s29 = smov (!%p147_p2), 111  }
   0xb   : > { %v543_v0 = vmov 0   ;;  %v544_v1 = vmov 2   ;;  %s727_s13 = smov (!%p174_p3, %s485_s13), 2  ;;  %v546_v5 = vmov 1   ;;  %v548_v6 = vmov 3   ;;  %v636_v29 = vld [vmem:[%s724_s2] sm:$0xff] }
   0xc   : > { %526 = vset.pattern.permute.xlu0 %v543_v0  ;;  %528 = vset.pattern.permute.xlu1 %v544_v1  ;;  %s492_s14 = sshll.u32 %s727_s13, 3  ;;  %s499_s15 = sshll.u32 %s727_s13, 4  ;;  %v550_v7 = vmov 5   ;;  %v552_v8 = vmov 4   ;;  %v554_v9 = vmov 7   ;;  %v556_v10 = vmov 6  }
   0xd   : > { %s182_s18 = scalar_lea.vmem %s723_s1, %s492_s14  ;;  %s178_s21 = scalar_lea.vmem %s722_s0, %s499_s15  ;;  %v557_v11 = vmov 8   ;;  %v199_v21 = vlaneseq  ;;  %v642_v31 = vld [vmem:[%s724_s2 + $0x8] sm:$0xff] }
   0xe   : > { %v190_v2 = vld [vmem:[%s182_s18] sm:$0xff]  ;;  %v603_v4 = vld [vmem:[%s178_s21 + $0x8] sm:$0xff]  ;;  %s187_s16 = scalar_lea.vmem %s725_s3, %s499_s15 }
   0xf   : > { %v600_v3 = vld [vmem:[%s178_s21] sm:$0xff]  ;;  %216 = vperm.xlu0 %526, %v190_v2   ;;  %v624_v24 = vshrl.u32 %v199_v21, 7  ;;  %v630_v27 = vand.u32 127, %v199_v21 }
  0x10   : > { %195 = vrot.lane.b32.xlu1 %v600_v3, %s545_s22 }
  0x11   : > { %v206_v28 = vsub.s32 0, %v624_v24  ;;  %v232_v30 = vsub.s32 1, %v624_v24  ;;  %v257_v32 = vsub.s32 2, %v624_v24  ;;  %vm227_vm0 = vcmp.lt.s32.totalorder %v630_v27, 16 }
  0x12   : > { %v282_v33 = vsub.s32 3, %v624_v24  ;;  %v300_v34 = vsub.s32 4, %v624_v24  ;;  %vm201_vm1 = vcmp.lt.s32.totalorder %v630_v27, 17  ;;  %vm252_vm2 = vcmp.lt.s32.totalorder %v630_v27, 15 }
  0x13   : > { %527 = vset.pattern.permute.xlu0 %v546_v5  ;;  %v207_v36 = vrot.slane %v636_v29, %v206_v28  ;;  %v211_v37 = vrot.slane %v642_v31, %v206_v28  ;;  %v233_v38 = vrot.slane %v636_v29, %v232_v30  ;;  %v237_v39 = vrot.slane %v642_v31, %v232_v30 }
  0x14   : > { %197 = vrot.lane.b32.xlu1 %v603_v4, %s545_s22  ;;  %241 = vperm.xlu0 %527, %v190_v2   ;;  %v258_v43 = vrot.slane %v636_v29, %v257_v32  ;;  %v262_v44 = vrot.slane %v642_v31, %v257_v32  ;;  %vm277_vm3 = vcmp.lt.s32.totalorder %v630_v27, 1  ;;  %v283_v45 = vrot.slane %v636_v29, %v282_v33 }
  0x15   : > { %v301_v46 = vrot.slane %v636_v29, %v300_v34  ;;  %v305_v47 = vrot.slane %v642_v31, %v300_v34  ;;  %v287_v51 = vrot.slane %v642_v31, %v282_v33  ;;  %v325_v52 = vsub.s32 5, %v624_v24 }
  0x16   : > { %v350_v59 = vsub.s32 6, %v624_v24  ;;  %vm320_vm4 = vcmp.lt.s32.totalorder %v630_v27, 127  ;;  %vm345_vm5 = vcmp.lt.s32.totalorder %v630_v27, 113  ;;  %vm370_vm6 = vcmp.lt.s32.totalorder %v630_v27, 112 }
  0x17   : > { %v307_v62 = vmul.f32 %v305_v47, %v603_v4  ;;  %v306_v63 = vmul.f32 %v301_v46, %v600_v3  ;;  %vm395_vm7 = vcmp.lt.s32.totalorder %v630_v27, 111 }
  0x18   : > { %223 = vrot.lane.b32.xlu1 %v600_v3, %s547_s23  ;;  %225 = vrot.lane.b32.xlu0 %v603_v4, %s547_s23 }
  0x19   : > { %529 = vset.pattern.permute.xlu0 %v548_v6  ;;  %v326_v6 = vrot.slane %v636_v29, %v325_v52 }
  0x1c   : > { %266 = vperm.xlu1 %528, %v190_v2   ;;  %248 = vrot.lane.b32.xlu0 %v600_v3, %s549_s24 }
  0x20   : > { %250 = vrot.lane.b32.xlu1 %v603_v4, %s549_s24  ;;  %291 = vperm.xlu0 %529, %v190_v2  }
  0x21   : > { %531 = vset.pattern.permute.xlu1 %v550_v7 }
  0x24   : > { %273 = vrot.lane.b32.xlu1 %v600_v3, %s551_s25  ;;  %530 = vset.pattern.permute.xlu0 %v552_v8 }
  0x25   : > { %309 = vperm.xlu0 %530, %v190_v2  }
  0x28   : > { %275 = vrot.lane.b32.xlu1 %v603_v4, %s551_s25 }
  0x29   : > { %318 = vrot.lane.b32.xlu0 %v603_v4, %s553_s26 }
  0x2a   : > { %533 = vset.pattern.permute.xlu0 %v554_v9 }
  0x2c   : > { %334 = vperm.xlu1 %531, %v190_v2  }
  0x2d   : > { %341 = vrot.lane.b32.xlu0 %v600_v3, %s555_s27 }
  0x30   : > { %316 = vrot.lane.b32.xlu1 %v600_v3, %s553_s26 }
  0x31   : > { %532 = vset.pattern.permute.xlu1 %v556_v10  ;;  %384 = vperm.xlu0 %533, %v190_v2  }
  0x34   : > { %359 = vperm.xlu1 %532, %v190_v2  }
  0x35   : > { %534 = vset.pattern.permute.xlu0 %v557_v11  ;;  %v330_v11 = vrot.slane %v642_v31, %v325_v52 }
  0x36   : > { %409 = vperm.xlu0 %534, %v190_v2  }
  0x38   : > { %343 = vrot.lane.b32.xlu1 %v603_v4, %s555_s27 }
  0x3c   : > { %366 = vrot.lane.b32.xlu1 %v600_v3, %s558_s28 }
  0x40   : > { %368 = vrot.lane.b32.xlu1 %v603_v4, %s558_s28 }
  0x44   : > { %391 = vrot.lane.b32.xlu1 %v600_v3, %s559_s29  ;;  %v375_v3 = vsub.s32 7, %v624_v24 }
  0x46   : > { %v376_v32 = vrot.slane %v636_v29, %v375_v3  ;;  %v380_v33 = vrot.slane %v642_v31, %v375_v3 }
  0x48   : > { %393 = vrot.lane.b32.xlu1 %v603_v4, %s559_s29  ;;  %v351_v4 = vrot.slane %v636_v29, %v350_v59 }
  0x82   : > { %v196_v12 = vpop.permute.xlu1 %195 }
  0x86   : > { %v198_v13 = vpop.permute.xlu1 %197 }
  0x87   : > { %v202_v53 = vsel %vm201_vm1, %v196_v12, %v198_v13  ;;  %v203_v54 = vsel %vm201_vm1, %v198_v13, %v196_v12 }
  0x88   : > { %v212_v2 = vmul.f32 %v207_v36, %v203_v54  ;;  %v213_v5 = vmul.f32 %v211_v37, %v202_v53 }
  0x8a   : > { %v224_v14 = vpop.permute.xlu1 %223  ;;  %v620_v15 = vpop.permute.xlu0 %216 }
  0x8b   : > { %v219_v12 = vmul.f32 %v620_v15, %v212_v2  ;;  %v220_v13 = vmul.f32 %v620_v15, %v213_v5 }
  0x8f   : > { %v242_v17 = vpop.permute.xlu0 %241 }
  0x93   : > { %v226_v19 = vpop.permute.xlu0 %225 }
  0x94   : > { %v228_v41 = vsel %vm227_vm0, %v224_v14, %v226_v19  ;;  %v229_v42 = vsel %vm227_vm0, %v226_v19, %v224_v14 }
  0x95   : > { %v238_v55 = vmul.f32 %v233_v38, %v229_v42  ;;  %v239_v56 = vmul.f32 %v237_v39, %v228_v41 }
  0x97   : > { %v622_v16 = vpop.permute.xlu1 %266  ;;  %v249_v22 = vpop.permute.xlu0 %248  ;;  %v244_v7 = vmul.f32 %v242_v17, %v238_v55  ;;  %v245_v8 = vmul.f32 %v242_v17, %v239_v56  ;;  %v495_v55 = vld [vmem:[%s724_s2 + $0x10] ss:$0 sm:$0xff] }
  0x99   : > { %v247_v24 = vadd.f32 %v245_v8, %v220_v13 }
  0x9b   : > { %v251_v18 = vpop.permute.xlu1 %250  ;;  %v626_v25 = vpop.permute.xlu0 %291 }
  0x9c   : > { %v253_v49 = vsel %vm252_vm2, %v249_v22, %v251_v18  ;;  %v254_v50 = vsel %vm252_vm2, %v251_v18, %v249_v22  ;;  %v355_v22 = vrot.slane %v642_v31, %v350_v59 }
  0x9d   : > { %v263_v60 = vmul.f32 %v258_v43, %v254_v50  ;;  %v264_v61 = vmul.f32 %v262_v44, %v253_v49 }
  0x9f   : > { %v274_v20 = vpop.permute.xlu1 %273  ;;  %v269_v14 = vmul.f32 %v622_v16, %v263_v60  ;;  %v270_v18 = vmul.f32 %v622_v16, %v264_v61 }
  0xa0   : > { %v654_v40 = vpop.permute.xlu0 %309 }
  0xa1   : > { %v312_v39 = vmul.f32 %v654_v40, %v306_v63  ;;  %v313_v41 = vmul.f32 %v654_v40, %v307_v62 }
  0xa3   : > { %v276_v23 = vpop.permute.xlu1 %275 }
  0xa4   : > { %v278_v57 = vsel %vm277_vm3, %v274_v20, %v276_v23  ;;  %v279_v58 = vsel %vm277_vm3, %v276_v23, %v274_v20  ;;  %v319_v0 = vpop.permute.xlu0 %318  ;;  %v246_v23 = vadd.f32 %v244_v7, %v219_v12 }
  0xa5   : > { %v288_v9 = vmul.f32 %v283_v45, %v279_v58  ;;  %v289_v10 = vmul.f32 %v287_v51, %v278_v57 }
  0xa6   : > { %v271_v34 = vadd.f32 %v269_v14, %v246_v23 }
  0xa7   : > { %v628_v26 = vpop.permute.xlu1 %334  ;;  %v294_v15 = vmul.f32 %v626_v25, %v288_v9  ;;  %v295_v28 = vmul.f32 %v626_v25, %v289_v10 }
  0xa8   : > { %v342_v19 = vpop.permute.xlu0 %341 }
  0xa9   : > { %v296_v43 = vadd.f32 %v294_v15, %v271_v34 }
  0xab   : > { %v317_v35 = vpop.permute.xlu1 %316  ;;  %v314_v40 = vadd.f32 %v312_v39, %v296_v43 }
  0xac   : > { %v321_v20 = vsel %vm320_vm4, %v317_v35, %v319_v0  ;;  %v322_v21 = vsel %vm320_vm4, %v319_v0, %v317_v35  ;;  %v272_v35 = vadd.f32 %v270_v18, %v247_v24  ;;  %v385_v51 = vpop.permute.xlu0 %384 }
  0xad   : > { %v331_v36 = vmul.f32 %v326_v6, %v321_v20  ;;  %v332_v37 = vmul.f32 %v330_v11, %v322_v21 }
  0xae   : > { %v297_v44 = vadd.f32 %v295_v28, %v272_v35 }
  0xaf   : > { %v662_v48 = vpop.permute.xlu1 %359  ;;  %v337_v31 = vmul.f32 %v628_v26, %v331_v36  ;;  %v338_v46 = vmul.f32 %v628_v26, %v332_v37  ;;  %v496_v26 = vld [vmem:[%s724_s2 + $0x18] ss:$0 sm:$0xff] }
  0xb0   : > { %v315_v52 = vadd.f32 %v313_v41, %v297_v44 }
  0xb1   : > { %v339_v56 = vadd.f32 %v337_v31, %v314_v40  ;;  %v410_v62 = vpop.permute.xlu0 %409 }
  0xb2   : > { %v340_v57 = vadd.f32 %v338_v46, %v315_v52 }
  0xb3   : > { %v344_v1 = vpop.permute.xlu1 %343 }
  0xb4   : > { %v346_v16 = vsel %vm345_vm5, %v342_v19, %v344_v1  ;;  %v347_v30 = vsel %vm345_vm5, %v344_v1, %v342_v19 }
  0xb5   : > { %v356_v29 = vmul.f32 %v351_v4, %v346_v16  ;;  %v357_v45 = vmul.f32 %v355_v22, %v347_v30 }
  0xb7   : > { %v367_v17 = vpop.permute.xlu1 %366  ;;  %v362_v53 = vmul.f32 %v662_v48, %v356_v29  ;;  %v363_v54 = vmul.f32 %v662_v48, %v357_v45 }
  0xb9   : > { %v364_v63 = vadd.f32 %v362_v53, %v339_v56  ;;  %v365_v0 = vadd.f32 %v363_v54, %v340_v57 }
  0xbb   : > { %v369_v38 = vpop.permute.xlu1 %368 }
  0xbc   : > { %v371_v25 = vsel %vm370_vm6, %v367_v17, %v369_v38  ;;  %v372_v42 = vsel %vm370_vm6, %v369_v38, %v367_v17 }
  0xbd   : > { %v381_v47 = vmul.f32 %v376_v32, %v371_v25  ;;  %v382_v49 = vmul.f32 %v380_v33, %v372_v42 }
  0xbf   : > { %v392_v50 = vpop.permute.xlu1 %391  ;;  %v387_v58 = vmul.f32 %v385_v51, %v381_v47  ;;  %v388_v59 = vmul.f32 %v385_v51, %v382_v49 }
  0xc1   : > { %v389_v2 = vadd.f32 %v387_v58, %v364_v63  ;;  %v390_v5 = vadd.f32 %v388_v59, %v365_v0 }
  0xc3   : > { %v394_v27 = vpop.permute.xlu1 %393 }
  0xc4   : > { %v396_v60 = vsel %vm395_vm7, %v392_v50, %v394_v27  ;;  %v397_v61 = vsel %vm395_vm7, %v394_v27, %v392_v50 }
  0xc5   : > { %v406_v48 = vmul.f32 %v495_v55, %v396_v60  ;;  %v407_v1 = vmul.f32 %v496_v26, %v397_v61 }
  0xc7   : > { %v412_v6 = vmul.f32 %v410_v62, %v406_v48  ;;  %v413_v7 = vmul.f32 %v410_v62, %v407_v1 }
  0xc9   : > { %v414_v8 = vadd.f32 %v412_v6, %v389_v2  ;;  %v415_v9 = vadd.f32 %v413_v7, %v390_v5 }
  0xcb   : > { %416 = vst [vmem:[%s187_s16] sm:$0xff] %v414_v8  ;;  %417 = vst [vmem:[%s187_s16 + $0x8] sm:$0xff] %v415_v9 }
  0xcc PF: > { %s13_s12 = sadd.s32 1, %s541_s12  }
  0xcd   : > { %p10_p4 = scmp.ge.s32.totalorder %s13_s12, 5  }
  0xcf   :  { %12 = sbr.rel (!%p10_p4) target bundleno = 1 (0x1), region = 65 }

</bundles_post_ra>
